<compile_context>
chip_gen: v7x
topology: tpu7x:2x2x1
jax: 0.10.0
libtpu: 0.0.40
codegen_flags: <defaults>
</compile_context>

<pallas_src>
import jax
import jax.numpy as jnp
from jax.experimental import pallas as pl
from jax.experimental.pallas import tpu as pltpu


# ----------------------------------------------------------------------------
# Kernels
# ----------------------------------------------------------------------------
def _make_fused_kernel(inv_hw):
    def _fused_kernel(x_ref, w1_ref, b1_ref, w2_ref, b2_ref, o_ref):
        """One image per grid step: pool -> MLP -> sigmoid -> scale, x resident."""
        xv = x_ref[...]                                              # (1, C, HW)
        pooled = jnp.sum(xv.astype(jnp.float32), axis=-1) * inv_hw   # (1, C) f32
        y1 = jnp.dot(pooled, w1_ref[...].astype(jnp.float32),
                     preferred_element_type=jnp.float32)
        y1 = jnp.maximum(y1 + b1_ref[...].astype(jnp.float32), 0.0)  # (1, Cr)
        y2 = jnp.dot(y1, w2_ref[...].astype(jnp.float32),
                     preferred_element_type=jnp.float32)
        gate = jax.nn.sigmoid(y2 + b2_ref[...].astype(jnp.float32))  # (1, C) f32
        gate = gate.astype(xv.dtype)[:, :, None]                     # (1, C, 1)
        o_ref[...] = (xv * gate).astype(o_ref.dtype)
    return _fused_kernel


def _pool_kernel(x_ref, psum_ref, acc_ref):
    """Per-channel sums over HW with a wide (lane=128) f32 accumulator.

    x_ref   : (1, ct, hwt) block (channels on sublanes, spatial on lanes)
    psum_ref: (1, ct, 1)   f32 output, resident across the HW grid axis
    acc_ref : (1, ct, 128) f32 VMEM scratch
    """
    @pl.when(pl.program_id(2) == 0)
    def _():
        acc_ref[...] = jnp.zeros_like(acc_ref)

    xv = x_ref[...].astype(jnp.float32)           # (1, ct, hwt)
    hwt = xv.shape[-1]
    # Pure-VALU adds of 128-lane groups (static, 128-aligned slices); the
    # cross-lane reduce happens only once, at the final HW step below.
    part = xv[:, :, 0:128]
    for g in range(1, hwt // 128):
        part = part + xv[:, :, g * 128:(g + 1) * 128]
    acc_ref[...] += part

    @pl.when(pl.program_id(2) == pl.num_programs(2) - 1)
    def _():
        psum_ref[...] = jnp.sum(acc_ref[...], axis=-1, keepdims=True)


def _make_gate_kernel(inv_hw):
    def _gate_kernel(psum_ref, w1_ref, b1_ref, w2_ref, b2_ref, gate_ref):
        """Batched excite MLP: all B gates in two small MXU matmuls (f32)."""
        pooled = psum_ref[...] * inv_hw                              # (B, C)
        y1 = jnp.dot(pooled, w1_ref[...].astype(jnp.float32),
                     preferred_element_type=jnp.float32)
        y1 = jnp.maximum(y1 + b1_ref[...].astype(jnp.float32), 0.0)  # (B, Cr)
        y2 = jnp.dot(y1, w2_ref[...].astype(jnp.float32),
                     preferred_element_type=jnp.float32)
        gate_ref[...] = jax.nn.sigmoid(
            y2 + b2_ref[...].astype(jnp.float32))                    # (B, C) f32
    return _gate_kernel


def _scale_kernel(x_ref, gate_ref, o_ref):
    """out = x * gate. gate block (1, ct, 1) broadcasts over the lane (HW) axis.
    The gate is pre-cast to x's dtype in the wrapper (bf16 math on bf16 inputs)."""
    o_ref[...] = (x_ref[...] * gate_ref[...]).astype(o_ref.dtype)


# ----------------------------------------------------------------------------
# Generation-aware budgets & tiling helpers
# ----------------------------------------------------------------------------
def _device_budgets():
    """(vmem_limit_bytes, per-block byte budget, fused per-image x-byte cap)."""
    try:
        kind = jax.devices()[0].device_kind.lower()
    except Exception:  # no device info -> be conservative (v7x numbers)
        kind = "v7"
    is_v7 = "v7" in kind
    phys_vmem = (64 << 20) if is_v7 else (128 << 20)
    vmem_limit = min(96 << 20, (phys_vmem * 3) // 4)   # 48 MiB v7x, 96 MiB else
    tile_budget = (2 << 20) if is_v7 else (4 << 20)    # per-block bytes target
    fused_cap = vmem_limit // 8                        # per-image x bytes
    return vmem_limit, tile_budget, fused_cap


def _round_up(x, m):
    return (x + m - 1) // m * m


def _largest_aligned_divisor(dim, align, cap):
    """Largest t <= cap with t % align == 0 and dim % t == 0 (needs align|dim)."""
    best = align
    for t in range(align, min(dim, cap) + 1, align):
        if dim % t == 0:
            best = t
    return best


def _pick_ct(C, B, budget_elems):
    """Channel (sublane) tile. Full C if not 8-aligned (legal: equals full dim)."""
    if C % 8 != 0:
        return C
    cap = C
    if B < 2 and C >= 16:
        # Keep >= 2 parallel steps on the pool grid for v7x's two TensorCores.
        cap = max(8, (C // 2) // 8 * 8)
    cap = min(cap, max(8, (budget_elems // 128) // 8 * 8))
    return _largest_aligned_divisor(C, 8, cap)


def _pick_hwt(HWp, ct, budget_elems):
    """Spatial (lane) tile: biggest 128-multiple divisor within the byte budget.
    Capped at 8192 lanes to bound the unrolled lane-group adds in _pool_kernel."""
    cap = (budget_elems // max(ct, 1)) // 128 * 128
    cap = max(128, min(cap, 8192))
    return _largest_aligned_divisor(HWp, 128, cap)


# ----------------------------------------------------------------------------
# Forward
# ----------------------------------------------------------------------------
def se_forward(x_nchw, w1, b1, w2, b2, *, force_path=None):
    """x_nchw: (B, C, H, W). Weights: w1 (C, Cr), b1 (Cr,), w2 (Cr, C), b2 (C,)."""
    B, C, H, W = x_nchw.shape
    HW = H * W
    Cr = w1.shape[1]
    itemsize = jnp.dtype(x_nchw.dtype).itemsize
    vmem_limit, tile_budget, fused_cap = _device_budgets()

    x3 = x_nchw.reshape(B, C, HW)          # free view (contiguous)
    inv_hw = 1.0 / HW

    use_fused = C * HW * itemsize <= fused_cap
    if force_path == "fused":
        use_fused = True
    elif force_path == "tiled":
        use_fused = False

    # ---- Fused single-call path: x read once, written once ------------------
    if use_fused:
        out3 = pl.pallas_call(
            _make_fused_kernel(inv_hw),
            out_shape=jax.ShapeDtypeStruct((B, C, HW), x_nchw.dtype),
            grid_spec=pltpu.PrefetchScalarGridSpec(
                num_scalar_prefetch=0,
                grid=(B,),
                in_specs=[
                    pl.BlockSpec((1, C, HW), lambda b: (b, 0, 0)),   # x (resident)
                    pl.BlockSpec((C, Cr), lambda b: (0, 0)),         # w1
                    pl.BlockSpec((1, Cr), lambda b: (0, 0)),         # b1
                    pl.BlockSpec((Cr, C), lambda b: (0, 0)),         # w2
                    pl.BlockSpec((1, C), lambda b: (0, 0)),          # b2
                ],
                out_specs=pl.BlockSpec((1, C, HW), lambda b: (b, 0, 0)),
            ),
            compiler_params=pltpu.CompilerParams(
                dimension_semantics=("parallel",),
                vmem_limit_bytes=vmem_limit),
        )(x3, w1, b1.reshape(1, Cr), w2, b2.reshape(1, C))
        return out3.reshape(B, C, H, W)

    # ---- Tiled three-stage path ---------------------------------------------
    # Pad HW up to a multiple of 128 (exact for the mean: zeros in padded lanes,
    # divide by the true HW; padded lanes are sliced off after the scale pass).
    HWp = _round_up(HW, 128)
    if HWp != HW:
        x3 = jnp.pad(x3, ((0, 0), (0, 0), (0, HWp - HW)))

    budget_elems = max(8 * 128, tile_budget // itemsize)
    ct = _pick_ct(C, B, budget_elems)
    hwt = _pick_hwt(HWp, ct, budget_elems)
    grid = (B, C // ct, HWp // hwt)

    # Stage 1: squeeze (per-channel sum over HW), f32 wide accumulator.
    psum = pl.pallas_call(
        _pool_kernel,
        out_shape=jax.ShapeDtypeStruct((B, C, 1), jnp.float32),
        grid_spec=pltpu.PrefetchScalarGridSpec(
            num_scalar_prefetch=0,
            grid=grid,
            in_specs=[pl.BlockSpec((1, ct, hwt), lambda b, c, h: (b, c, h))],
            out_specs=pl.BlockSpec((1, ct, 1), lambda b, c, h: (b, c, 0)),
            scratch_shapes=[pltpu.VMEM((1, ct, 128), jnp.float32)],
        ),
        compiler_params=pltpu.CompilerParams(
            dimension_semantics=("parallel", "parallel", "arbitrary"),
            vmem_limit_bytes=vmem_limit),
    )(x3)

    # Stage 2: excite MLP, batched over B (one tiny call).
    gate = pl.pallas_call(
        _make_gate_kernel(inv_hw),
        out_shape=jax.ShapeDtypeStruct((B, C), jnp.float32),
        grid_spec=pltpu.PrefetchScalarGridSpec(
            num_scalar_prefetch=0,
            grid=(1,),
            in_specs=[
                pl.BlockSpec((B, C), lambda i: (0, 0)),    # pooled sums
                pl.BlockSpec((C, Cr), lambda i: (0, 0)),   # w1
                pl.BlockSpec((1, Cr), lambda i: (0, 0)),   # b1
                pl.BlockSpec((Cr, C), lambda i: (0, 0)),   # w2
                pl.BlockSpec((1, C), lambda i: (0, 0)),    # b2
            ],
            out_specs=pl.BlockSpec((B, C), lambda i: (0, 0)),
        ),
    )(psum.reshape(B, C), w1, b1.reshape(1, Cr), w2, b2.reshape(1, C))

    # Stage 3: scale (lane-dense stores, fully parallel grid).
    gate3 = gate.reshape(B, C, 1)
    if x_nchw.dtype != jnp.float32:
        gate3 = gate3.astype(x_nchw.dtype)   # bf16 multiply on bf16 inputs

    out3 = pl.pallas_call(
        _scale_kernel,
        out_shape=jax.ShapeDtypeStruct((B, C, HWp), x_nchw.dtype),
        grid_spec=pltpu.PrefetchScalarGridSpec(
            num_scalar_prefetch=0,
            grid=grid,
            in_specs=[
                pl.BlockSpec((1, ct, hwt), lambda b, c, h: (b, c, h)),  # x
                pl.BlockSpec((1, ct, 1), lambda b, c, h: (b, c, 0)),    # gate
            ],
            out_specs=pl.BlockSpec((1, ct, hwt), lambda b, c, h: (b, c, h)),
        ),
        compiler_params=pltpu.CompilerParams(
            dimension_semantics=("parallel", "parallel", "parallel"),
            vmem_limit_bytes=vmem_limit),
    )(x3, gate3)

    if HWp != HW:
        out3 = out3[:, :, :HW]
    return out3.reshape(B, C, H, W)


# ----------------------------------------------------------------------------
# Pure-JAX reference (mirrors the PyTorch forward)
# ----------------------------------------------------------------------------
def se_reference(x, w1, b1, w2, b2):
    y = jnp.mean(x, axis=(2, 3))                       # (B, C)
    y = jnp.maximum(y @ w1 + b1, 0.0)                  # (B, Cr)
    y = jax.nn.sigmoid(y @ w2 + b2)                    # (B, C)
    return x * y[:, :, None, None]


if __name__ == "__main__":
    # Module config: n_features=C must be divisible by reduction (default 16).
    B, C, H, W = 2, 32, 16, 16
    reduction = 16
    Cr = C // reduction

    key = jax.random.PRNGKey(0)
    kx, k1, k2, k3, k4 = jax.random.split(key, 5)

    x = jax.random.normal(kx, (B, C, H, W), dtype=jnp.float32)
    # Deterministic synthetic parameters (nn.Linear(C, Cr) / nn.Linear(Cr, C)).
    w1 = jax.random.normal(k1, (C, Cr), dtype=jnp.float32) * 0.1   # linear1.weight.T
    b1 = jax.random.normal(k2, (Cr,), dtype=jnp.float32) * 0.1     # linear1.bias
    w2 = jax.random.normal(k3, (Cr, C), dtype=jnp.float32) * 0.1   # linear2.weight.T
    b2 = jax.random.normal(k4, (C,), dtype=jnp.float32) * 0.1      # linear2.bias

    ref = se_reference(x, w1, b1, w2, b2)

    # Default dispatch: this shape takes the fused single-pass path.
    out = jax.block_until_ready(se_forward(x, w1, b1, w2, b2))
    assert out.shape == (B, C, H, W)
    assert jnp.allclose(out, ref, atol=1e-5, rtol=1e-5), "fused path mismatch"

    # Also exercise the tiled (pool -> MLP -> scale) path on the same data.
    out_t = jax.block_until_ready(se_forward(x, w1, b1, w2, b2, force_path="tiled"))
    assert jnp.allclose(out_t, ref, atol=1e-5, rtol=1e-5), "tiled path mismatch"

    # Tiled path with a non-128-multiple spatial size (exercises zero-padding).
    H2 = W2 = 10
    x2 = jax.random.normal(kx, (B, C, H2, W2), dtype=jnp.float32)
    ref2 = se_reference(x2, w1, b1, w2, b2)
    out2 = jax.block_until_ready(se_forward(x2, w1, b1, w2, b2, force_path="tiled"))
    assert jnp.allclose(out2, ref2, atol=1e-5, rtol=1e-5), "padded tiled path mismatch"

    print("KERNEL_OK")
</pallas_src>

<mosaic_0001>
module attributes {stable_mosaic.version = 11 : i64} {
  func.func @_fused_kernel(%arg0: i32, %arg1: memref<1x32x256xf32, #tpu.memory_space<vmem>>, %arg2: memref<32x2xf32, #tpu.memory_space<vmem>>, %arg3: memref<1x2xf32, #tpu.memory_space<vmem>>, %arg4: memref<2x32xf32, #tpu.memory_space<vmem>>, %arg5: memref<1x32xf32, #tpu.memory_space<vmem>>, %arg6: memref<1x32x256xf32, #tpu.memory_space<vmem>>) attributes {dimension_semantics = [#tpu.dimension_semantics<parallel>], iteration_bounds = array<i64: 2>, scalar_prefetch = 0 : i64, scratch_operands = 0 : i64, tpu.core_type = #tpu.core_type<tc>, window_params = [{transform_indices = @transform_0, window_bounds = array<i64: 1, 32, 256>}, {pipeline_mode = #tpu.pipeline_mode<synchronous>, transform_indices = @transform_1, window_bounds = array<i64: 32, 2>}, {pipeline_mode = #tpu.pipeline_mode<synchronous>, transform_indices = @transform_2, window_bounds = array<i64: 1, 2>}, {pipeline_mode = #tpu.pipeline_mode<synchronous>, transform_indices = @transform_3, window_bounds = array<i64: 2, 32>}, {pipeline_mode = #tpu.pipeline_mode<synchronous>, transform_indices = @transform_4, window_bounds = array<i64: 1, 32>}, {transform_indices = @transform_5, window_bounds = array<i64: 1, 32, 256>}]} {
    %c0 = arith.constant 0 : index
    %c0_0 = arith.constant 0 : index
    %c0_1 = arith.constant 0 : index
    %0 = vector.load %arg1[%c0, %c0_0, %c0_1] : memref<1x32x256xf32, #tpu.memory_space<vmem>>, vector<1x32x256xf32>
    %cst = arith.constant dense<0.000000e+00> : vector<1x32xf32>
    %1 = vector.multi_reduction <add>, %0, %cst [2] : vector<1x32x256xf32> to vector<1x32xf32>
    %cst_2 = arith.constant 3.906250e-03 : f32
    %2 = vector.broadcast %cst_2 : f32 to vector<1x32xf32>
    %3 = arith.mulf %1, %2 : vector<1x32xf32>
    %c0_3 = arith.constant 0 : index
    %c0_4 = arith.constant 0 : index
    %4 = vector.load %arg2[%c0_3, %c0_4] : memref<32x2xf32, #tpu.memory_space<vmem>>, vector<32x2xf32>
    %cst_5 = arith.constant dense<0.000000e+00> : vector<1x2xf32>
    %5 = tpu.matmul %3, %4, %cst_5 {dimension_numbers = #tpu.dot_dimension_numbers<[1], [0], [0], [1], [0, 0, 1, 1], [], []>} : vector<1x32xf32>, vector<32x2xf32>, vector<1x2xf32> -> vector<1x2xf32>
    %c0_6 = arith.constant 0 : index
    %c0_7 = arith.constant 0 : index
    %6 = vector.load %arg3[%c0_6, %c0_7] : memref<1x2xf32, #tpu.memory_space<vmem>>, vector<1x2xf32>
    %7 = arith.addf %5, %6 : vector<1x2xf32>
    %cst_8 = arith.constant 0.000000e+00 : f32
    %8 = vector.broadcast %cst_8 : f32 to vector<1x2xf32>
    %9 = arith.maximumf %7, %8 : vector<1x2xf32>
    %c0_9 = arith.constant 0 : index
    %c0_10 = arith.constant 0 : index
    %10 = vector.load %arg4[%c0_9, %c0_10] : memref<2x32xf32, #tpu.memory_space<vmem>>, vector<2x32xf32>
    %cst_11 = arith.constant dense<0.000000e+00> : vector<1x32xf32>
    %11 = tpu.matmul %9, %10, %cst_11 {dimension_numbers = #tpu.dot_dimension_numbers<[1], [0], [0], [1], [0, 0, 1, 1], [], []>} : vector<1x2xf32>, vector<2x32xf32>, vector<1x32xf32> -> vector<1x32xf32>
    %c0_12 = arith.constant 0 : index
    %c0_13 = arith.constant 0 : index
    %12 = vector.load %arg5[%c0_12, %c0_13] : memref<1x32xf32, #tpu.memory_space<vmem>>, vector<1x32xf32>
    %13 = arith.addf %11, %12 : vector<1x32xf32>
    %14 = arith.negf %13 : vector<1x32xf32>
    %15 = math.exp %14 : vector<1x32xf32>
    %cst_14 = arith.constant 1.000000e+00 : f32
    %16 = vector.broadcast %cst_14 : f32 to vector<1x32xf32>
    %17 = arith.addf %16, %15 : vector<1x32xf32>
    %18 = arith.divf %16, %17 : vector<1x32xf32>
    %19 = vector.shape_cast %18 : vector<1x32xf32> to vector<1x32x1xf32>
    %20 = vector.broadcast %19 : vector<1x32x1xf32> to vector<1x32x256xf32>
    %21 = arith.mulf %0, %20 : vector<1x32x256xf32>
    %c0_15 = arith.constant 0 : index
    %c0_16 = arith.constant 0 : index
    %c0_17 = arith.constant 0 : index
    %22 = vector.load %arg6[%c0_15, %c0_16, %c0_17] : memref<1x32x256xf32, #tpu.memory_space<vmem>>, vector<1x32x256xf32>
    tpu.vector_store %arg6[%c0_15, %c0_16, %c0_17], %21 {strides = array<i32>} : memref<1x32x256xf32, #tpu.memory_space<vmem>>, vector<1x32x256xf32>,
    return
  }
  func.func @transform_0(%arg0: i32) -> (i32, i32, i32) {
    %c0_i32 = arith.constant 0 : i32
    %c0_i32_0 = arith.constant 0 : i32
    %c0_i32_1 = arith.constant 0 : i32
    return %arg0, %c0_i32, %c0_i32_0 : i32, i32, i32
  }
  func.func @transform_1(%arg0: i32) -> (i32, i32) {
    %c0_i32 = arith.constant 0 : i32
    %c0_i32_0 = arith.constant 0 : i32
    %c0_i32_1 = arith.constant 0 : i32
    return %c0_i32, %c0_i32_0 : i32, i32
  }
  func.func @transform_2(%arg0: i32) -> (i32, i32) {
    %c0_i32 = arith.constant 0 : i32
    %c0_i32_0 = arith.constant 0 : i32
    %c0_i32_1 = arith.constant 0 : i32
    return %c0_i32, %c0_i32_0 : i32, i32
  }
  func.func @transform_3(%arg0: i32) -> (i32, i32) {
    %c0_i32 = arith.constant 0 : i32
    %c0_i32_0 = arith.constant 0 : i32
    %c0_i32_1 = arith.constant 0 : i32
    return %c0_i32, %c0_i32_0 : i32, i32
  }
  func.func @transform_4(%arg0: i32) -> (i32, i32) {
    %c0_i32 = arith.constant 0 : i32
    %c0_i32_0 = arith.constant 0 : i32
    %c0_i32_1 = arith.constant 0 : i32
    return %c0_i32, %c0_i32_0 : i32, i32
  }
  func.func @transform_5(%arg0: i32) -> (i32, i32, i32) {
    %c0_i32 = arith.constant 0 : i32
    %c0_i32_0 = arith.constant 0 : i32
    %c0_i32_1 = arith.constant 0 : i32
    return %arg0, %c0_i32, %c0_i32_0 : i32, i32, i32
  }
}

</mosaic_0001>

<bundles_post_ra>
// kernel: tpu_custom_call.1
= control target key start
LH: loop header
LB: loop body
LE: loop exit
PB: predicated region body
PF: predicated region fallthrough
CT: control target
= control target key end

     0   :  { %10 = vsyncpa [#allocation3], 0  ;;  %s1408_s0 = inlined_call_operand.hbm [shape: f32[2,32,256], index: 0, kind: input, shape index: {}]   ;;  %s1409_s1 = inlined_call_operand.hbm [shape: f32[32,2], index: 1, kind: input, shape index: {}]   ;;  %s1410_s2 = inlined_call_operand.hbm [shape: f32[1,2], index: 2, kind: input, shape index: {}]   ;;  %s1411_s3 = inlined_call_operand.hbm [shape: f32[2,32], index: 3, kind: input, shape index: {}]   ;;  %s1412_s4 = inlined_call_operand.hbm [shape: f32[1,32], index: 4, kind: input, shape index: {}]   ;;  %s1413_s5 = inlined_call_operand.hbm [shape: f32[2,32,256], index: 5, kind: output, shape index: {}]  }
   0x1   :  { %12 = vsyncpa [#allocation3 + $0x1], 0 }
   0x2   :  { %13 = vsyncpa [#allocation6], 0 }
   0x3   :  { %14 = vsyncpa [#allocation9], 0 }
   0x4   :  { %15 = vsyncpa [#allocation4], 0 }
   0x5   :  { %17 = vsyncpa [#allocation4 + $0x1], 0  ;;  %s1095_s18 = smov 0   ;;  %s1097_s19 = smov 0  }
   0x6   :  { %s1099_s20 = smov 0   ;;  %s1101_s21 = smov 0  }
   0x7 LB: > { %s1116_s22 = sadd.s32 4294967295, %s1048_s21   ;;  %s675_s23 = sadd.s32 4294967294, %s1048_s21   ;;  %s1048_s21 = sphi %s1101_s21, %s1436_s21   ;;  %s1044_s20 = sphi %s1099_s20, %s1435_s20   ;;  %s1040_s19 = sphi %s1097_s19, %s1434_s19   ;;  %s1036_s18 = sphi %s1095_s18, %s1433_s18  }
   0x8   : > { %p43_p0 = scmp.ne.s32.totalorder %s1040_s19, %s1036_s18  ;;  %p1414_p1 = scmp.eq.s32.totalorder %s1116_s22, 0 }
   0x9   : > { %p157_p3 = scmp.eq.s32.totalorder %s675_s23, 1  ;;  %p676_p5 = scmp.ge.s32.totalorder %s1048_s21, 1 }
   0xa   : > { %p1125_p4 = por %p1414_p1, %p43_p0  ;;  %p164_p7 = scmp.lt.s32.totalorder %s1048_s21, 3 }
   0xb   : > { %p1130_p6 = por %p157_p3, %p43_p0  ;;  %s1050_s27 = smov [#allocation5]  }
   0xc   : > { %s1417_s24 = scalar_select %p1125_p4, 1, 0 }
   0xd   : > { %s1418_s25 = scalar_select %p1130_p6, 1, 0 }
   0xe   : > { %p1135_p8 = pnand %p676_p5, %p164_p7  ;;  %s176_s28 = sshll.u32 %s1050_s27, 4  ;;  %s1139_s28 = int_to_ptr.vmem [resolvable:$true] %s176_s28 }
   0xf   : > { %s1051_s30 = smov [#allocation8]   ;;  %s1052_s7 = smov [#allocation7]  }
  0x10   : > { %s1419_s26 = scalar_select %p1135_p8, 1, 0 }
  0x11   : > { %p752_p9 = pneg %p1135_p8  ;;  %s201_s6 = sshll.u32 %s1051_s30, 4  ;;  %s1150_s6 = int_to_ptr.vmem [resolvable:$true] %s201_s6 }
  0x12   : > { %s1152_s8 = sshll.u32 %s1052_s7, 4  ;;  %s832_s11 = scalar_lea.hbm %s1409_s1, 512  ;;  %s191_s8 = int_to_ptr.vmem [resolvable:$true] %s1152_s8 }
  0x13   : > { %p1146_p11 = pnand %p752_p9, %p1414_p1  ;;  %p833_p12 = scmp.ne.s32.totalorder %s1409_s1, %s832_s11 }
  0x14   : > { %p839_p5 = scmp.lt.u32.totalorder %s832_s11, %s1409_s1 }
  0x15   : > { %p1162_p13 = pneg %p1146_p11 }
  0x17   : > { %p835_p0 = pnand %p1162_p13, %p833_p12 }
  0x19   : > { %p836_p3 = pneg %p835_p0 }
  0x1b   : > { %p841_p7 = pnand %p839_p5, %p836_p3 }
  0x1d   : > { %844 = shalt.err (!%p841_p7)
}
  0x1e   : > { %s845_s17 = scalar_lea.vmem %s1139_s28, 512  ;;  %p853_p2 = scmp.lt.s32.totalorder %s1139_s28, %s1139_s28 }
  0x1f   : > { %p846_p9 = scmp.ne.s32.totalorder %s1139_s28, %s845_s17  ;;  %p854_p6 = scmp.lt.s32.totalorder %s845_s17, %s845_s17 }
  0x21   : > { %p848_p10 = pnand %p846_p9, %p1162_p13  ;;  %p855_p12 = por %p854_p6, %p853_p2 }
  0x23   : > { %p849_p1 = pneg %p848_p10 }
  0x25   : > { %p856_p0 = pnand %p855_p12, %p849_p1 }
  0x27   : > { %859 = shalt.err (!%p856_p0)
}
  0x28   : > { %s1053_s23 = smov 128   ;;  %s1054_s27 = smov 8  }
  0x29   : > { %755 = dma.hbm_to_vmem [thread:$0]  (!%p1146_p11), %s1409_s1, 512, %s1139_s28, [#allocation6], %s1053_s23, %s1053_s23, %s1054_s27  }
  0x2a   : > { %s860_s11 = scalar_lea.hbm %s1411_s3, 32 }
  0x2b   : > { %p861_p2 = scmp.ne.s32.totalorder %s1411_s3, %s860_s11  ;;  %p867_p10 = scmp.lt.u32.totalorder %s860_s11, %s1411_s3 }
  0x2d   : > { %p863_p1 = pnand %p861_p2, %p1162_p13 }
  0x2f   : > { %p864_p6 = pneg %p863_p1 }
  0x31   : > { %p869_p3 = pnand %p867_p10, %p864_p6 }
  0x33   : > { %872 = shalt.err (!%p869_p3)
}
  0x34   : > { %s873_s28 = scalar_lea.vmem %s1150_s6, 32  ;;  %p881_p12 = scmp.lt.s32.totalorder %s1150_s6, %s1150_s6 }
  0x35   : > { %p874_p5 = scmp.ne.s32.totalorder %s1150_s6, %s873_s28  ;;  %p882_p0 = scmp.lt.s32.totalorder %s873_s28, %s873_s28 }
  0x37   : > { %p876_p7 = pnand %p874_p5, %p1162_p13  ;;  %p883_p2 = por %p882_p0, %p881_p12 }
  0x39   : > { %p877_p9 = pneg %p876_p7 }
  0x3b   : > { %p884_p1 = pnand %p883_p2, %p877_p9 }
  0x3d   : > { %887 = shalt.err (!%p884_p1)
}
  0x3e   : > { %761 = dma.hbm_to_vmem [thread:$0]  (!%p1146_p11), %s1411_s3, 32, %s1150_s6, [#allocation9]  }
  0x3f   : > { %s888_s7 = scalar_lea.hbm %s1410_s2, 16 }
  0x40   : > { %p889_p6 = scmp.ne.s32.totalorder %s1410_s2, %s888_s7  ;;  %p895_p5 = scmp.lt.u32.totalorder %s888_s7, %s1410_s2 }
  0x42   : > { %p891_p10 = pnand %p889_p6, %p1162_p13 }
  0x44   : > { %p892_p3 = pneg %p891_p10 }
  0x46   : > { %p897_p7 = pnand %p895_p5, %p892_p3 }
  0x48   : > { %900 = shalt.err (!%p897_p7)
}
  0x49   : > { %s901_s13 = scalar_lea.vmem %s191_s8, 16  ;;  %s908_s6 = scalar_lea.vmem %s191_s8, 32 }
  0x4a   : > { %p902_p9 = scmp.ne.s32.totalorder %s191_s8, %s901_s13  ;;  %p909_p2 = scmp.lt.s32.totalorder %s191_s8, %s191_s8 }
  0x4b   : > { %p910_p1 = scmp.lt.s32.totalorder %s908_s6, %s901_s13 }
  0x4c   : > { %p904_p12 = pnand %p902_p9, %p1162_p13 }
  0x4d   : > { %p911_p4 = por %p910_p1, %p909_p2 }
  0x4e   : > { %p905_p0 = pneg %p904_p12 }
  0x50   : > { %p912_p8 = pnand %p911_p4, %p905_p0 }
  0x52   : > { %915 = shalt.err (!%p912_p8)
}
  0x53   : > { %758 = dma.hbm_to_vmem [thread:$0]  (!%p1146_p11), %s1410_s2, 16, %s191_s8, [#allocation6]  }
  0x54   : > { %s1055_s28 = smov [#allocation10]   ;;  %s916_s30 = scalar_lea.hbm %s1412_s4, 16 }
  0x55   : > { %s212_s17 = sshll.u32 %s1055_s28, 4  ;;  %p917_p6 = scmp.ne.s32.totalorder %s1412_s4, %s916_s30  ;;  %s213_s17 = int_to_ptr.vmem [resolvable:$true] %s212_s17 }
  0x56   : > { %p923_p10 = scmp.lt.u32.totalorder %s916_s30, %s1412_s4 }
  0x57   : > { %p919_p4 = pnand %p917_p6, %p1162_p13 }
  0x59   : > { %p920_p8 = pneg %p919_p4 }
  0x5b   : > { %p925_p3 = pnand %p923_p10, %p920_p8 }
  0x5d   : > { %928 = shalt.err (!%p925_p3)
}
  0x5e   : > { %s929_s8 = scalar_lea.vmem %s213_s17, 16  ;;  %s936_s12 = scalar_lea.vmem %s213_s17, 32 }
  0x5f   : > { %p930_p5 = scmp.ne.s32.totalorder %s213_s17, %s929_s8  ;;  %p937_p12 = scmp.lt.s32.totalorder %s213_s17, %s213_s17 }
  0x60   : > { %p938_p0 = scmp.lt.s32.totalorder %s936_s12, %s929_s8 }
  0x61   : > { %p932_p7 = pnand %p930_p5, %p1162_p13 }
  0x62   : > { %p939_p2 = por %p938_p0, %p937_p12 }
  0x63   : > { %p933_p9 = pneg %p932_p7 }
  0x65   : > { %p940_p1 = pnand %p939_p2, %p933_p9 }
  0x67   : > { %943 = shalt.err (!%p940_p1)
}
  0x68   : > { %764 = dma.hbm_to_vmem [thread:$0]  (!%p1146_p11), %s1412_s4, 16, %s213_s17, [#allocation9]  }
  0x69   : > { %s1244_s14 = sadd.s32 1, %s1048_s21   ;;  %s30_s15 = sadd.s32 1, %s1044_s20 }
  0x6a   : > { %s27_s29 = ssub.s32 %s1048_s21, %s1244_s14  ;;  %p37_p13 = scmp.ne.s32.totalorder %s1044_s20, %s1040_s19 }
  0x6b   : > { %p28_p6 = scmp.eq.s32.totalorder %s27_s29, 0  ;;  %p38_p4 = scmp.eq.s32.totalorder %s1048_s21, 0 }
  0x6c   : > { %p1422_p8 = scmp.eq.s32.totalorder %s1116_s22, 1  ;;  %p777_p3 = scmp.lt.s32.totalorder %s1048_s21, 2 }
  0x6d   : > { %s1260_s28 = scalar_select %p28_p6, %s1044_s20, %s30_s15  }
  0x6e   : > { %p1254_p10 = por %p1422_p8, %p37_p13  ;;  %p39_p5 = por %p38_p4, %p37_p13 }
  0x6f   : > { %s223_s23 = sand.u32 1, %s1044_s20   ;;  %s701_s17 = sshll.u32 %s1048_s21, 10 }
  0x70   : > { %s682_s27 = sshll.u32 %s223_s23, 6  ;;  %s1267_s9 = scalar_lea.hbm %s1408_s0, %s701_s17 }
  0x71   : > { %s227_s10 = scalar_lea.vmem [#allocation2], %s682_s27  ;;  %p1271_p11 = pnand %p777_p3, %p39_p5 }
  0x72   : > { %s234_s11 = sshll.u32 %s227_s10, 4  ;;  %s1275_s12 = scalar_lea.sflag [#allocation3], %s223_s23  ;;  %s1269_s11 = int_to_ptr.vmem [resolvable:$true] %s234_s11 }
  0x73   : > { %s944_s13 = scalar_lea.hbm %s1267_s9, 1024  ;;  %p946_p9 = pneg %p1271_p11 }
  0x74   : > { %p945_p7 = scmp.ne.s32.totalorder %s1267_s9, %s944_s13  ;;  %s949_s29 = scalar_lea.hbm %s1408_s0, 2048 }
  0x75   : > { %p950_p2 = scmp.lt.u32.totalorder %s1267_s9, %s1408_s0  ;;  %p951_p1 = scmp.lt.u32.totalorder %s949_s29, %s944_s13 }
  0x76   : > { %p947_p12 = pnand %p946_p9, %p945_p7  ;;  %p953_p6 = scmp.lt.u32.totalorder %s944_s13, %s1267_s9 }
  0x77   : > { %p952_p13 = por %p951_p1, %p950_p2 }
  0x78   : > { %p948_p0 = pneg %p947_p12 }
  0x79   : > { %p954_p4 = por %p953_p6, %p952_p13 }
  0x7b   : > { %p955_p8 = pnand %p954_p4, %p948_p0 }
  0x7d   : > { %958 = shalt.err (!%p955_p8)
}
  0x7e   : > { %s959_s23 = scalar_lea.vmem %s1269_s11, 1024  ;;  %s1056_s30 = smov [#allocation2]  }
  0x7f   : > { %p960_p3 = scmp.ne.s32.totalorder %s1269_s11, %s959_s23  ;;  %s964_s7 = sshll.u32 %s1056_s30, 4  ;;  %s965_s7 = int_to_ptr.vmem [resolvable:$false] %s964_s7 }
  0x80   : > { %s966_s10 = scalar_lea.vmem %s965_s7, 2048  ;;  %p967_p12 = scmp.lt.s32.totalorder %s1269_s11, %s965_s7 }
  0x81   : > { %p962_p5 = pnand %p960_p3, %p946_p9  ;;  %p968_p2 = scmp.lt.s32.totalorder %s966_s10, %s959_s23 }
  0x83   : > { %p963_p7 = pneg %p962_p5  ;;  %p969_p1 = por %p968_p2, %p967_p12 }
  0x85   : > { %p970_p13 = pnand %p969_p1, %p963_p7 }
  0x87   : > { %973 = shalt.err (!%p970_p13)
}
  0x88   : > { %s1057_s13 = smov 256   ;;  %s1058_s6 = smov 16  }
  0x89   : > { %768 = dma.hbm_to_vmem [thread:$0]  (!%p1271_p11), %s1267_s9, 1024, %s1269_s11, %s1275_s12, %s1057_s13, %s1057_s13, %s1058_s6  }
  0x8a   : > { %p1425_p9 = scmp.ne.s32.totalorder %s1419_s26, 0 }
  0x8b   : > { %s1306_s15 = sand.u32 (!%p1425_p9), 1, %s1040_s19   ;;  %p1426_p0 = scmp.ne.s32.totalorder (!%p1425_p9), %s1417_s24, 0 }
  0x8c   : > { %246 = sbr.rel (%p1425_p9) target bundleno = 909 (0x38d), region = 40  ;;  %s686_s29 = sshll.u32 (!%p1425_p9), %s1306_s15, 6 }
  0x8d   : > { %s249_s27 = scalar_lea.sflag (!%p1425_p9), [#allocation3], %s1306_s15  ;;  %s252_s17 = scalar_lea.vmem (!%p1425_p9), [#allocation2], %s686_s29 }
  0x93   : > { %1019 = dma.done.wait (%p1426_p0), %s249_s27, 1024  }
  0x94   : > { %1021 = vsyncadd (%p1426_p0), %s249_s27, 4294966272  ;;  %p1427_p11 = scmp.eq.s32.totalorder %s1116_s22, 0 }
  0x96   : > { %1023 = dma.done.wait (%p1427_p11), [#allocation6], 528   ;;  %p1428_p6 = pmov %p1427_p11 }
  0x98   : > { %1025 = vsyncadd (%p1428_p6), [#allocation6], 4294966768  ;;  %p1429_p4 = pmov %p1428_p6 }
  0x9a   : > { %1027 = dma.done.wait (%p1429_p4), [#allocation9], 48   ;;  %p1430_p8 = pmov %p1429_p4 }
  0x9b   : > { %v1324_v0 = vld [vmem:[%s252_s17] sm:$0xff]  ;;  %v1326_v1 = vld [vmem:[%s252_s17 + $0x8] sm:$0xff]  ;;  %v1334_v5 = vld [vmem:[%s252_s17 + $0x10] sm:$0xff]  ;;  %v1059_v15 = vmov 0.0|0.0   ;;  %vm1060_vm0 = vmmov 0   ;;  %v1061_v19 = vmov 0.0   ;;  %v328_v20 = vlaneseq }
  0x9c   : > { %1029 = vsyncadd (%p1430_p8), [#allocation9], 4294967248  ;;  %v1328_v2 = vld [vmem:[%s252_s17 + $0x20] sm:$0xff]  ;;  %v303_v3 = vadd.f32 %v1326_v1, %v1324_v0  ;;  %v1332_v4 = vld [vmem:[%s252_s17 + $0x28] sm:$0xff]  ;;  %726 = vmatprep.subr.bf16.mxu0 %v1059_v15  ;;  %718 = vmatprep.mubr.msk.f32.mxu0 %vm1060_vm0, %v1061_v19  ;;  %vm339_vm1 = vcmask 130112   ;;  %vm346_vm2 = vcmask 195712  }
  0x9d   : > { %v1336_v6 = vld [vmem:[%s252_s17 + $0x18] sm:$0xff]  ;;  %v309_v7 = vadd.f32 %v1332_v4, %v1328_v2  ;;  %v1340_v8 = vld [vmem:[%s252_s17 + $0x30] sm:$0xff]  ;;  %v319_v12 = vld [vmem:[#allocation5] sm:$0xff]  ;;  %721 = vmatprep.subr.mxu1 %v1061_v19  ;;  %723 = vmatprep.mubr.msk.f32.mxu1 %vm1060_vm0, %v1061_v19  ;;  %v329_v21 = vand.u32 127, %v328_v20  ;;  %v331_v22 = vshrl.u32 %v328_v20, 7  ;;  %vm353_vm3 = vcmask 261312  }
  0x9e   : > { %v1342_v9 = vld [vmem:[%s252_s17 + $0x38] sm:$0xff]  ;;  %304 = vadd.xlane.f32.xlu0 %v303_v3  ;;  %v306_v10 = vadd.f32 %v1336_v6, %v1334_v5  ;;  %v320_v13 = vld [vmem:[#allocation5 + $0x8] sm:$0xff]  ;;  %v321_v16 = vld [vmem:[#allocation5 + $0x10] sm:$0xff]  ;;  %vm355_vm4 = vcmask 261120   ;;  %vm435_vm5 = vcmask 1041408   ;;  %vm431_vm6 = vcmask 15360  }
  0x9f   : > { %310 = vadd.xlane.f32.xlu1 %v309_v7  ;;  %v312_v11 = vadd.f32 %v1342_v9, %v1340_v8  ;;  %v727_v14 = vpack.c.bf16 %v320_v13, %v319_v12  ;;  %v322_v17 = vld [vmem:[#allocation5 + $0x18] sm:$0xff]  ;;  %v334_v23 = vadd.s32 4294967288, %v329_v21  ;;  %v341_v25 = vadd.s32 4294967280, %v329_v21  ;;  %v429_v45 = vld [vmem:[#allocation8] sm:$0x3]  ;;  %s294_s24 = scalar_lea.vmem [#allocation11], %s686_s29 }
  0xa0   : > { %v730_v18 = vpack.c.bf16 %v322_v17, %v321_v16  ;;  %v348_v26 = vadd.s32 4294967272, %v329_v21  ;;  %v332_v28 = vsub.s32 %v329_v21, %v331_v22  ;;  %722 = vmatpush3.msk.msra.mxu1 %vm435_vm5, %v429_v45  ;;  %v323_v46 = vld [vmem:[#allocation7] sm:$0x1]  ;;  %v430_v51 = vld [vmem:[#allocation10] sm:$0x1]  ;;  %v517_v58 = vsub.s32 0, %v331_v22 }
  0xa1   : > { %728 = vmatpush3.bf16.msra.mxu0 %v727_v14  ;;  %v337_v30 = vsub.s32 %v334_v23, %v331_v22  ;;  %v344_v31 = vsub.s32 %v341_v25, %v331_v22  ;;  %s564_s26 = sshll.u32 %s294_s24, 4  ;;  %s702_s9 = sshll.u32 %s1116_s22, 10  ;;  %s1357_s26 = int_to_ptr.vmem [resolvable:$true] %s564_s26 }
  0xa2   : > { %307 = vadd.xlane.f32.xlu0 %v306_v10  ;;  %729 = vmatprep.subr.bf16.mxu0 %v1059_v15  ;;  %v351_v34 = vsub.s32 %v348_v26, %v331_v22  ;;  %s1362_s12 = scalar_lea.hbm %s1413_s5, %s702_s9  ;;  %s551_s22 = scalar_lea.sflag [#allocation4], %s1306_s15 }
  0xa3   : > { %313 = vadd.xlane.f32.xlu1 %v312_v11  ;;  %s974_s23 = scalar_lea.vmem %s1357_s26, 1024  ;;  %s1062_s30 = smov [#allocation11]  }
  0xa4   : > { %p975_p3 = scmp.ne.s32.totalorder %s1357_s26, %s974_s23  ;;  %s978_s7 = sshll.u32 %s1062_s30, 4  ;;  %s979_s7 = int_to_ptr.vmem [resolvable:$false] %s978_s7 }
  0xa5   : > { %731 = vmatpush3.bf16.msra.mxu0 %v730_v18  ;;  %s980_s10 = scalar_lea.vmem %s979_s7, 2048  ;;  %p981_p12 = scmp.lt.s32.totalorder %s1357_s26, %s979_s7 }
  0xa6   : > { %p976_p5 = pnand %p975_p3, %p1254_p10  ;;  %p982_p2 = scmp.lt.s32.totalorder %s980_s10, %s974_s23 }
  0xa8   : > { %p977_p7 = pneg %p976_p5  ;;  %p983_p1 = por %p982_p2, %p981_p12 }
  0xaa   : > { %p984_p13 = pnand %p983_p1, %p977_p7 }
 0x12b   : > { %v305_v24 = vpop.xlane.xlu0 %304 }
 0x12c   : > { %v311_v27 = vpop.xlane.xlu1 %310  ;;  %v315_v29 = vmul.f32 0.00390625, %v305_v24 }
 0x12d   : > { %v317_v32 = vmul.f32 0.00390625, %v311_v27 }
 0x12e   : > { %v333_v38 = vrot.slane %v315_v29, %v332_v28 }
 0x12f   : > { %v308_v33 = vpop.xlane.xlu0 %307  ;;  %v345_v40 = vrot.slane %v317_v32, %v344_v31 }
 0x130   : > { %v316_v35 = vmul.f32 0.00390625, %v308_v33  ;;  %v314_v36 = vpop.xlane.xlu1 %313 }
 0x131   : > { %v318_v37 = vmul.f32 0.00390625, %v314_v36 }
 0x132   : > { %v338_v39 = vrot.slane %v316_v35, %v337_v30 }
 0x133   : > { %v352_v41 = vrot.slane %v318_v37, %v351_v34 }
 0x134   : > { %v340_v42 = vsel %vm339_vm1, %v338_v39, %v333_v38 }
 0x135   : > { %v347_v43 = vsel %vm346_vm2, %v345_v40, %v340_v42 }
 0x136   : > { %v354_v44 = vsel %vm353_vm3, %v352_v41, %v347_v43 }
 0x137   : > { %719 = vmatmul.mubr.msk.f32.vlgmr.msra.gmra.mrb[0].mxu0 %vm355_vm4, %v354_v44 }
 0x20a   : > { %v424_v47 = vpop.f32.mrb[0].mxu0 }
 0x20b   : > { %v425_v48 = vadd.f32 %v424_v47, %v323_v46  ;;  %v720_v49 = vpop.f32.mrb[1].mxu0 }
 0x20d   : > { %v428_v50 = vmax.f32 %v425_v48, 0.0 }
 0x20f   : > { %724 = vmatmul.mubr.msk.f32.vlgmr.msra.gmra.mrb[0].mxu1 %vm431_vm6, %v428_v50 }
 0x2e2   : > { %v505_v52 = vpop.f32.mrb[0].mxu1 }
 0x2e3   : > { %v506_v53 = vadd.f32 %v505_v52, %v430_v51  ;;  %v725_v54 = vpop.f32.mrb[1].mxu1 }
 0x2e5   : > { %v695_v55 = vmul.f32 -1.442695, %v506_v53 }
 0x2e7   : > { %828 = vpow2.f32 %v695_v55 }
 0x2f1   : > { %v829_v56 = vpop.eup %828 }
 0x2f2   : > { %v512_v57 = vadd.f32 1.0, %v829_v56 }
 0x2f4   : > { %830 = vrcp.f32 %v512_v57 }
 0x2fe   : > { %v831_v59 = vpop.eup %830 }
 0x2ff   : > { %v518_v60 = vrot.slane %v831_v59, %v517_v58 }
 0x301   : > { %524 = vbcast.lane.b32.xlu1 %v518_v60, 264  ;;  %520 = vbcast.lane.b32.xlu0 %v518_v60, 256 }
 0x305   : > { %528 = vbcast.lane.b32.xlu1 %v518_v60, 272 }
 0x309   : > { %532 = vbcast.lane.b32.xlu1 %v518_v60, 280 }
 0x373   : > { %v525_v61 = vpop.permute.xlu1 %524  ;;  %v521_v62 = vpop.permute.xlu0 %520 }
 0x374   : > { %v536_v63 = vmul.f32 %v525_v61, %v1334_v5  ;;  %v537_v3 = vmul.f32 %v525_v61, %v1336_v6  ;;  %v534_v7 = vmul.f32 %v521_v62, %v1324_v0  ;;  %v535_v10 = vmul.f32 %v521_v62, %v1326_v1 }
 0x376   : > { %544 = vst [vmem:[%s294_s24 + $0x10] sm:$0xff] %v536_v63  ;;  %545 = vst [vmem:[%s294_s24 + $0x18] sm:$0xff] %v537_v3 }
 0x377   : > { %542 = vst [vmem:[%s294_s24] sm:$0xff] %v534_v7  ;;  %543 = vst [vmem:[%s294_s24 + $0x8] sm:$0xff] %v535_v10  ;;  %v529_v11 = vpop.permute.xlu1 %528 }
 0x378   : > { %v538_v12 = vmul.f32 %v529_v11, %v1328_v2  ;;  %v539_v5 = vmul.f32 %v529_v11, %v1332_v4 }
 0x37a   : > { %546 = vst [vmem:[%s294_s24 + $0x20] sm:$0xff] %v538_v12  ;;  %547 = vst [vmem:[%s294_s24 + $0x28] sm:$0xff] %v539_v5 }
 0x37b   : > { %v533_v0 = vpop.permute.xlu1 %532 }
 0x37c   : > { %v540_v1 = vmul.f32 %v533_v0, %v1340_v8  ;;  %v541_v2 = vmul.f32 %v533_v0, %v1342_v9 }
 0x37e   : > { %548 = vst [vmem:[%s294_s24 + $0x30] sm:$0xff] %v540_v1  ;;  %549 = vst [vmem:[%s294_s24 + $0x38] sm:$0xff] %v541_v2 }
 0x37f   : > { %987 = shalt.err (!%p984_p13)
}
 0x380   : > { %s988_s13 = scalar_lea.hbm %s1362_s12, 1024  ;;  %s992_s27 = scalar_lea.hbm %s1413_s5, 2048 }
 0x381   : > { %p989_p9 = scmp.ne.s32.totalorder %s1362_s12, %s988_s13  ;;  %p993_p6 = scmp.lt.u32.totalorder %s1362_s12, %s1413_s5 }
 0x382   : > { %p994_p4 = scmp.lt.u32.totalorder %s992_s27, %s988_s13  ;;  %p996_p3 = scmp.lt.u32.totalorder %s988_s13, %s1362_s12 }
 0x383   : > { %p990_p0 = pnand %p989_p9, %p1254_p10 }
 0x384   : > { %p995_p8 = por %p994_p4, %p993_p6 }
 0x385   : > { %p991_p11 = pneg %p990_p0 }
 0x386   : > { %p997_p5 = por %p996_p3, %p995_p8 }
 0x388   : > { %p998_p7 = pnand %p997_p5, %p991_p11 }
 0x38a   : > { %1001 = shalt.err (!%p998_p7)
}
 0x38b   : > { %s1063_s9 = smov 256   ;;  %s1064_s11 = smov 16  }
 0x38c   : > { %750 = dma.vmem_to_hbm [thread:$0]  (%p1254_p10), %s1357_s26, 1024, %s1362_s12, %s551_s22, %s1063_s9, %s1063_s9, %s1064_s11  }
 0x38d PF: > { %s579_s8 = sand.u32 1, %s1036_s18   ;;  %p1431_p12 = scmp.ne.s32.totalorder %s1418_s25, 0 }
 0x38e   : > { %p1432_p2 = scmp.ge.s32.totalorder %s1048_s21, 2  ;;  %s580_s23 = scalar_lea.sflag [#allocation4], %s579_s8 }
 0x390   : > { %p770_p1 = pnand %p1432_p2, %p1431_p12 }
 0x392   : > { %1031 = dma.done.wait (!%p770_p1), %s580_s23, 1024  }
 0x393   : > { %1033 = vsyncadd (!%p770_p1), %s580_s23, 4294966272  ;;  %p20_p13 = scmp.ge.s32.totalorder %s1244_s14, 4   ;;  %s1433_s18 = smov %s1040_s19 }
 0x394   : > { %s1434_s19 = smov %s1044_s20  ;;  %s1435_s20 = smov %s1260_s28 }
 0x395   : > { %s1436_s21 = smov %s1244_s14  ;;  %22 = sbr.rel (!%p20_p13) target bundleno = 7 (0x7), region = 101 }
 0x39c   :  { %585 = vsyncpa [#allocation3], 1 }
 0x39d   :  { %587 = vsyncpa [#allocation3 + $0x1], 1 }
 0x39e   :  { %588 = vsyncpa [#allocation6], 1 }
 0x39f   :  { %589 = vsyncpa [#allocation9], 1 }
 0x3a0   :  { %590 = vsyncpa [#allocation4], 1 }
 0x3a1   :  { %592 = vsyncpa [#allocation4 + $0x1], 1 }

</bundles_post_ra>
